<compile_context>
chip_gen: v7x
topology: tpu7x:2x2x1
jax: 0.10.0
libtpu: 0.0.40
codegen_flags: <defaults>
</compile_context>

<pallas_src>
import jax
import jax.numpy as jnp
from jax import lax
from jax.experimental import pallas as pl
from jax.experimental.pallas import tpu as pltpu

LN_EPS = 1e-12
_GATHER_UNROLL = 8          # issue row gathers in groups of 8 (one sublane group)

# Small demo config (same structure as bert-base-uncased, scaled down).
VOCAB_SIZE = 512            # config.vocab_size
MAX_POS = 32                # config.max_position_embeddings
HIDDEN = 128                # config.hidden_size (multiple of 128 -> lane dense)


def _layer_norm(emb, gamma, beta):
    # Two-pass statistics (mean, centered sum of squares): robust against the
    # E[x^2]-mean^2 cancellation that could go negative with eps=1e-12.
    mean = jnp.mean(emb, axis=-1, keepdims=True)
    centered = emb - mean
    var = jnp.mean(centered * centered, axis=-1, keepdims=True)
    return centered * lax.rsqrt(var + LN_EPS) * gamma + beta


# --------------------------------------------------------------------------- #
# Fast path: token table resident in VMEM, gather via dynamic VMEM row loads. #
# --------------------------------------------------------------------------- #
def _embeddings_kernel_vmem(ids_ref, pos_ref, tok_ref, gamma_ref, beta_ref,
                            out_ref, tok_buf):
    # ids_ref:   (B*S,)      int32  SMEM (scalar prefetch)
    # pos_ref:   (tile_s, H)        position rows for this seq tile
    # tok_ref:   (V, H)             token table, resident in VMEM (constant block)
    # gamma/beta:(1, H)
    # out_ref:   (tile_s, H)
    # tok_buf:   (tile_s, H)        VMEM scratch for the gathered rows
    t = pl.program_id(0)
    tile_s = out_ref.shape[0]
    vocab = tok_ref.shape[0]
    base = t * tile_s

    @pl.loop(0, tile_s // _GATHER_UNROLL)
    def _gather(g):
        for u in range(_GATHER_UNROLL):                 # unrolled group of 8 rows
            r = g * _GATHER_UNROLL + u
            tid = jnp.clip(ids_ref[base + r], 0, vocab - 1)
            tok_buf[pl.ds(r, 1), :] = tok_ref[pl.ds(tid, 1), :]

    emb = tok_buf[...].astype(jnp.float32) + pos_ref[...].astype(jnp.float32)
    out = _layer_norm(emb, gamma_ref[...].astype(jnp.float32),
                      beta_ref[...].astype(jnp.float32))
    out_ref[...] = out.astype(out_ref.dtype)            # Dropout == identity (eval)


# --------------------------------------------------------------------------- #
# General path: HBM-resident table, double-buffered DMA row gather.           #
# --------------------------------------------------------------------------- #
def _issue_row_gather(ids_ref, tok_hbm, tok_buf, sems, slot, base, tile_s, vocab):
    """Issue tile_s per-row HBM->VMEM copies against ONE shared semaphore."""
    @pl.loop(0, tile_s // _GATHER_UNROLL)
    def _issue(g):
        for u in range(_GATHER_UNROLL):                  # unrolled group of 8 rows
            r = g * _GATHER_UNROLL + u
            tid = jnp.clip(ids_ref[base + r], 0, vocab - 1)
            pltpu.make_async_copy(
                tok_hbm.at[pl.ds(tid, 1), :],
                tok_buf.at[slot, pl.ds(r, 1), :],
                sems.at[slot],
            ).start()


def _wait_row_gather(tok_hbm, tok_buf, sems, slot, tile_s):
    """Single aggregate wait: descriptor sized to the whole (tile_s, H) tile,
    byte count equals the sum of the tile_s row copies on this semaphore."""
    pltpu.make_async_copy(
        tok_hbm.at[pl.ds(0, tile_s), :],
        tok_buf.at[slot],
        sems.at[slot],
    ).wait()


def _embeddings_kernel_hbm(ids_ref, pos_ref, tok_hbm, gamma_ref, beta_ref,
                           out_ref, tok_buf, sems):
    # ids_ref:   (B*S,)        int32  SMEM (scalar prefetch, drives the gather)
    # pos_ref:   (tile_s, H)
    # tok_hbm:   (V, H)               token table, HBM (memory_space=pl.ANY)
    # gamma/beta:(1, H)
    # out_ref:   (tile_s, H)
    # tok_buf:   (2, tile_s, H)       double-buffered VMEM gather buffer
    # sems:      (2,)                 one shared DMA semaphore per slot
    t = pl.program_id(0)
    num_t = pl.num_programs(0)
    tile_s = out_ref.shape[0]
    vocab = tok_hbm.shape[0]
    slot = t % 2

    # Prime the pipeline: the first grid step gathers its own tile.
    @pl.when(t == 0)
    def _prime():
        _issue_row_gather(ids_ref, tok_hbm, tok_buf, sems, slot,
                          t * tile_s, tile_s, vocab)

    # Prefetch the NEXT tile's rows into the other slot (ids already in SMEM),
    # so its HBM latency hides behind this step's LayerNorm + output writeback.
    @pl.when(t + 1 < num_t)
    def _prefetch():
        _issue_row_gather(ids_ref, tok_hbm, tok_buf, sems, 1 - slot,
                          (t + 1) * tile_s, tile_s, vocab)

    # One aggregate wait for all rows of the current tile.
    _wait_row_gather(tok_hbm, tok_buf, sems, slot, tile_s)

    emb = tok_buf[slot].astype(jnp.float32) + pos_ref[...].astype(jnp.float32)
    out = _layer_norm(emb, gamma_ref[...].astype(jnp.float32),
                      beta_ref[...].astype(jnp.float32))
    out_ref[...] = out.astype(out_ref.dtype)             # Dropout == identity (eval)


# --------------------------------------------------------------------------- #
# Wrapper                                                                      #
# --------------------------------------------------------------------------- #
def embeddings_forward(input_ids, tok_table, pos_table, gamma, beta, *,
                       tile_s=None, out_dtype=None, table_in_vmem=None,
                       vmem_table_budget_bytes=4 * 1024 * 1024):
    """input_ids: [B, S] int -> [B, S, H] (eval-mode BERT Embeddings forward)."""
    B, S = input_ids.shape
    V, H = tok_table.shape
    P = pos_table.shape[0]
    assert S <= P, "sequence length exceeds max_position_embeddings"
    assert H % 128 == 0, "hidden size must be a multiple of 128 (lane dense)"

    if tile_s is None:
        tile_s = S
        while tile_s > 512 and tile_s % 2 == 0:          # big tiles amortize grid overhead
            tile_s //= 2
    assert S % tile_s == 0, "seq length must be a multiple of the seq tile"
    assert tile_s % _GATHER_UNROLL == 0, "seq tile must be a multiple of 8"
    assert tile_s <= V

    out_dtype = tok_table.dtype if out_dtype is None else jnp.dtype(out_dtype)
    ids = input_ids.reshape(-1).astype(jnp.int32)        # 1D -> no 2D SMEM padding
    gamma2 = gamma.reshape(1, H)
    beta2 = beta.reshape(1, H)

    table_bytes = V * H * tok_table.dtype.itemsize
    if table_in_vmem is None:
        # bert-base f32 (~94 MiB) / bf16 (~47 MiB) tables stay in HBM (esp. on
        # v7x with 64 MiB VMEM); raise the budget explicitly for small vocabs.
        table_in_vmem = table_bytes <= vmem_table_budget_bytes

    tiles_per_seq = S // tile_s
    num_tiles = B * tiles_per_seq

    pos_spec = pl.BlockSpec((tile_s, H), lambda t, ids: (t % tiles_per_seq, 0))
    gamma_spec = pl.BlockSpec((1, H), lambda t, ids: (0, 0))
    beta_spec = pl.BlockSpec((1, H), lambda t, ids: (0, 0))
    out_spec = pl.BlockSpec((tile_s, H), lambda t, ids: (t, 0))

    # Rough VMEM requirement (double-buffered blocks + scratch) for vmem_limit.
    est = 2 * tile_s * H * 4 + 2 * tile_s * H * out_dtype.itemsize
    if table_in_vmem:
        est += 2 * table_bytes + tile_s * H * tok_table.dtype.itemsize
        in_specs = [pos_spec,
                    pl.BlockSpec((V, H), lambda t, ids: (0, 0)),   # table resident in VMEM
                    gamma_spec, beta_spec]
        scratch = [pltpu.VMEM((tile_s, H), tok_table.dtype)]
        kernel = _embeddings_kernel_vmem
        dim_sem = ("parallel",)                 # no cross-step carry -> megacore OK
    else:
        est += 2 * tile_s * H * tok_table.dtype.itemsize
        in_specs = [pos_spec,
                    pl.BlockSpec(memory_space=pl.ANY),             # table stays in HBM
                    gamma_spec, beta_spec]
        scratch = [pltpu.VMEM((2, tile_s, H), tok_table.dtype),    # double buffer
                   pltpu.SemaphoreType.DMA((2,))]                  # one sem per slot
        kernel = _embeddings_kernel_hbm
        dim_sem = ("arbitrary",)                # cross-step prefetch carries state

    vmem_limit = int(min(64 * 1024 * 1024, max(2 * est + (1 << 20), 32 * 1024 * 1024)))

    grid_spec = pltpu.PrefetchScalarGridSpec(
        num_scalar_prefetch=1,                  # ids -> SMEM, drive gather / index maps
        grid=(num_tiles,),
        in_specs=in_specs,
        out_specs=out_spec,
        scratch_shapes=scratch,
    )

    out_flat = pl.pallas_call(
        kernel,
        out_shape=jax.ShapeDtypeStruct((B * S, H), out_dtype),
        grid_spec=grid_spec,
        compiler_params=pltpu.CompilerParams(
            dimension_semantics=dim_sem,
            vmem_limit_bytes=vmem_limit),
    )(ids, pos_table, tok_table, gamma2, beta2)

    return out_flat.reshape(B, S, H)


if __name__ == "__main__":
    key = jax.random.PRNGKey(0)
    k_tok, k_pos, k_ids = jax.random.split(key, 3)

    # Deterministic params (nn.Embedding ~ N(0,1); LayerNorm gamma=1, beta=0).
    tok_table = jax.random.normal(k_tok, (VOCAB_SIZE, HIDDEN), dtype=jnp.float32)
    pos_table = jax.random.normal(k_pos, (MAX_POS, HIDDEN), dtype=jnp.float32)
    gamma = jnp.ones((HIDDEN,), dtype=jnp.float32)
    beta = jnp.zeros((HIDDEN,), dtype=jnp.float32)

    B, S = 2, 8
    input_ids = jax.random.randint(k_ids, (B, S), 0, VOCAB_SIZE, dtype=jnp.int32)

    # Pure-JAX reference (eval-mode forward).
    ref = tok_table[input_ids] + pos_table[jnp.arange(S)][None, :, :]
    mean = ref.mean(-1, keepdims=True)
    var = ((ref - mean) ** 2).mean(-1, keepdims=True)
    ref = (ref - mean) / jnp.sqrt(var + LN_EPS) * gamma + beta

    # 1) Auto path: demo table (256 KiB) takes the VMEM-resident fast path.
    out_fast = jax.block_until_ready(
        embeddings_forward(input_ids, tok_table, pos_table, gamma, beta))
    assert out_fast.shape == (B, S, HIDDEN)
    assert jnp.allclose(out_fast, ref, atol=1e-4, rtol=1e-4), (
        float(jnp.max(jnp.abs(out_fast - ref))))

    # 2) Force the HBM-gather path (what a real BERT vocab uses): double-buffered
    #    per-row DMAs, one shared semaphore, single aggregate wait.
    out_hbm = jax.block_until_ready(
        embeddings_forward(input_ids, tok_table, pos_table, gamma, beta,
                           table_in_vmem=False))
    assert jnp.allclose(out_hbm, ref, atol=1e-4, rtol=1e-4), (
        float(jnp.max(jnp.abs(out_hbm - ref))))

    print("KERNEL_OK")
</pallas_src>

<mosaic_0001>
module attributes {stable_mosaic.version = 11 : i64} {
  func.func @_embeddings_kernel_vmem(%arg0: i32, %arg1: memref<16xi32, #tpu.memory_space<smem>>, %arg2: memref<8x128xf32, #tpu.memory_space<vmem>>, %arg3: memref<512x128xf32, #tpu.memory_space<vmem>>, %arg4: memref<1x128xf32, #tpu.memory_space<vmem>>, %arg5: memref<1x128xf32, #tpu.memory_space<vmem>>, %arg6: memref<8x128xf32, #tpu.memory_space<vmem>>, %arg7: memref<8x128xf32, #tpu.memory_space<vmem>>) attributes {dimension_semantics = [#tpu.dimension_semantics<parallel>], iteration_bounds = array<i64: 2>, scalar_prefetch = 1 : i64, scratch_operands = 1 : i64, tpu.core_type = #tpu.core_type<tc>, window_params = [{transform_indices = @transform_0, window_bounds = array<i64: 8, 128>}, {pipeline_mode = #tpu.pipeline_mode<synchronous>, transform_indices = @transform_1, window_bounds = array<i64: 512, 128>}, {pipeline_mode = #tpu.pipeline_mode<synchronous>, transform_indices = @transform_2, window_bounds = array<i64: 1, 128>}, {pipeline_mode = #tpu.pipeline_mode<synchronous>, transform_indices = @transform_3, window_bounds = array<i64: 1, 128>}, {transform_indices = @transform_4, window_bounds = array<i64: 8, 128>}]} {
    %c8_i32 = arith.constant 8 : i32
    %0 = arith.muli %arg0, %c8_i32 : i32
    %c0_i32 = arith.constant 0 : i32
    %c1_i32 = arith.constant 1 : i32
    %1 = arith.muli %c0_i32, %c1_i32 : i32
    %c0_i32_0 = arith.constant 0 : i32
    %2 = arith.addi %c0_i32_0, %1 : i32
    %c8_i32_1 = arith.constant 8 : i32
    %3 = arith.muli %2, %c8_i32_1 : i32
    %c0_i32_2 = arith.constant 0 : i32
    %4 = arith.addi %3, %c0_i32_2 : i32
    %5 = arith.addi %0, %4 : i32
    %6 = arith.index_cast %5 : i32 to index
    %7 = memref.load %arg1[%6] : memref<16xi32, #tpu.memory_space<smem>>
    %c0_i32_3 = arith.constant 0 : i32
    %c511_i32 = arith.constant 511 : i32
    %8 = arith.maxsi %c0_i32_3, %7 : i32
    %9 = arith.minsi %c511_i32, %8 : i32
    %10 = arith.index_cast %9 : i32 to index
    %c0 = arith.constant 0 : index
    %11 = vector.load %arg3[%10, %c0] : memref<512x128xf32, #tpu.memory_space<vmem>>, vector<1x128xf32>
    %12 = arith.index_cast %4 : i32 to index
    %c0_4 = arith.constant 0 : index
    %13 = vector.load %arg7[%12, %c0_4] : memref<8x128xf32, #tpu.memory_space<vmem>>, vector<1x128xf32>
    tpu.vector_store %arg7[%12, %c0_4], %11 {strides = array<i32>} : memref<8x128xf32, #tpu.memory_space<vmem>>, vector<1x128xf32>,
    %c8_i32_5 = arith.constant 8 : i32
    %14 = arith.muli %2, %c8_i32_5 : i32
    %c1_i32_6 = arith.constant 1 : i32
    %15 = arith.addi %14, %c1_i32_6 : i32
    %16 = arith.addi %0, %15 : i32
    %17 = arith.index_cast %16 : i32 to index
    %18 = memref.load %arg1[%17] : memref<16xi32, #tpu.memory_space<smem>>
    %c0_i32_7 = arith.constant 0 : i32
    %c511_i32_8 = arith.constant 511 : i32
    %19 = arith.maxsi %c0_i32_7, %18 : i32
    %20 = arith.minsi %c511_i32_8, %19 : i32
    %21 = arith.index_cast %20 : i32 to index
    %c0_9 = arith.constant 0 : index
    %22 = vector.load %arg3[%21, %c0_9] : memref<512x128xf32, #tpu.memory_space<vmem>>, vector<1x128xf32>
    %23 = arith.index_cast %15 : i32 to index
    %c0_10 = arith.constant 0 : index
    %24 = vector.load %arg7[%23, %c0_10] : memref<8x128xf32, #tpu.memory_space<vmem>>, vector<1x128xf32>
    tpu.vector_store %arg7[%23, %c0_10], %22 {strides = array<i32>} : memref<8x128xf32, #tpu.memory_space<vmem>>, vector<1x128xf32>,
    %c8_i32_11 = arith.constant 8 : i32
    %25 = arith.muli %2, %c8_i32_11 : i32
    %c2_i32 = arith.constant 2 : i32
    %26 = arith.addi %25, %c2_i32 : i32
    %27 = arith.addi %0, %26 : i32
    %28 = arith.index_cast %27 : i32 to index
    %29 = memref.load %arg1[%28] : memref<16xi32, #tpu.memory_space<smem>>
    %c0_i32_12 = arith.constant 0 : i32
    %c511_i32_13 = arith.constant 511 : i32
    %30 = arith.maxsi %c0_i32_12, %29 : i32
    %31 = arith.minsi %c511_i32_13, %30 : i32
    %32 = arith.index_cast %31 : i32 to index
    %c0_14 = arith.constant 0 : index
    %33 = vector.load %arg3[%32, %c0_14] : memref<512x128xf32, #tpu.memory_space<vmem>>, vector<1x128xf32>
    %34 = arith.index_cast %26 : i32 to index
    %c0_15 = arith.constant 0 : index
    %35 = vector.load %arg7[%34, %c0_15] : memref<8x128xf32, #tpu.memory_space<vmem>>, vector<1x128xf32>
    tpu.vector_store %arg7[%34, %c0_15], %33 {strides = array<i32>} : memref<8x128xf32, #tpu.memory_space<vmem>>, vector<1x128xf32>,
    %c8_i32_16 = arith.constant 8 : i32
    %36 = arith.muli %2, %c8_i32_16 : i32
    %c3_i32 = arith.constant 3 : i32
    %37 = arith.addi %36, %c3_i32 : i32
    %38 = arith.addi %0, %37 : i32
    %39 = arith.index_cast %38 : i32 to index
    %40 = memref.load %arg1[%39] : memref<16xi32, #tpu.memory_space<smem>>
    %c0_i32_17 = arith.constant 0 : i32
    %c511_i32_18 = arith.constant 511 : i32
    %41 = arith.maxsi %c0_i32_17, %40 : i32
    %42 = arith.minsi %c511_i32_18, %41 : i32
    %43 = arith.index_cast %42 : i32 to index
    %c0_19 = arith.constant 0 : index
    %44 = vector.load %arg3[%43, %c0_19] : memref<512x128xf32, #tpu.memory_space<vmem>>, vector<1x128xf32>
    %45 = arith.index_cast %37 : i32 to index
    %c0_20 = arith.constant 0 : index
    %46 = vector.load %arg7[%45, %c0_20] : memref<8x128xf32, #tpu.memory_space<vmem>>, vector<1x128xf32>
    tpu.vector_store %arg7[%45, %c0_20], %44 {strides = array<i32>} : memref<8x128xf32, #tpu.memory_space<vmem>>, vector<1x128xf32>,
    %c8_i32_21 = arith.constant 8 : i32
    %47 = arith.muli %2, %c8_i32_21 : i32
    %c4_i32 = arith.constant 4 : i32
    %48 = arith.addi %47, %c4_i32 : i32
    %49 = arith.addi %0, %48 : i32
    %50 = arith.index_cast %49 : i32 to index
    %51 = memref.load %arg1[%50] : memref<16xi32, #tpu.memory_space<smem>>
    %c0_i32_22 = arith.constant 0 : i32
    %c511_i32_23 = arith.constant 511 : i32
    %52 = arith.maxsi %c0_i32_22, %51 : i32
    %53 = arith.minsi %c511_i32_23, %52 : i32
    %54 = arith.index_cast %53 : i32 to index
    %c0_24 = arith.constant 0 : index
    %55 = vector.load %arg3[%54, %c0_24] : memref<512x128xf32, #tpu.memory_space<vmem>>, vector<1x128xf32>
    %56 = arith.index_cast %48 : i32 to index
    %c0_25 = arith.constant 0 : index
    %57 = vector.load %arg7[%56, %c0_25] : memref<8x128xf32, #tpu.memory_space<vmem>>, vector<1x128xf32>
    tpu.vector_store %arg7[%56, %c0_25], %55 {strides = array<i32>} : memref<8x128xf32, #tpu.memory_space<vmem>>, vector<1x128xf32>,
    %c8_i32_26 = arith.constant 8 : i32
    %58 = arith.muli %2, %c8_i32_26 : i32
    %c5_i32 = arith.constant 5 : i32
    %59 = arith.addi %58, %c5_i32 : i32
    %60 = arith.addi %0, %59 : i32
    %61 = arith.index_cast %60 : i32 to index
    %62 = memref.load %arg1[%61] : memref<16xi32, #tpu.memory_space<smem>>
    %c0_i32_27 = arith.constant 0 : i32
    %c511_i32_28 = arith.constant 511 : i32
    %63 = arith.maxsi %c0_i32_27, %62 : i32
    %64 = arith.minsi %c511_i32_28, %63 : i32
    %65 = arith.index_cast %64 : i32 to index
    %c0_29 = arith.constant 0 : index
    %66 = vector.load %arg3[%65, %c0_29] : memref<512x128xf32, #tpu.memory_space<vmem>>, vector<1x128xf32>
    %67 = arith.index_cast %59 : i32 to index
    %c0_30 = arith.constant 0 : index
    %68 = vector.load %arg7[%67, %c0_30] : memref<8x128xf32, #tpu.memory_space<vmem>>, vector<1x128xf32>
    tpu.vector_store %arg7[%67, %c0_30], %66 {strides = array<i32>} : memref<8x128xf32, #tpu.memory_space<vmem>>, vector<1x128xf32>,
    %c8_i32_31 = arith.constant 8 : i32
    %69 = arith.muli %2, %c8_i32_31 : i32
    %c6_i32 = arith.constant 6 : i32
    %70 = arith.addi %69, %c6_i32 : i32
    %71 = arith.addi %0, %70 : i32
    %72 = arith.index_cast %71 : i32 to index
    %73 = memref.load %arg1[%72] : memref<16xi32, #tpu.memory_space<smem>>
    %c0_i32_32 = arith.constant 0 : i32
    %c511_i32_33 = arith.constant 511 : i32
    %74 = arith.maxsi %c0_i32_32, %73 : i32
    %75 = arith.minsi %c511_i32_33, %74 : i32
    %76 = arith.index_cast %75 : i32 to index
    %c0_34 = arith.constant 0 : index
    %77 = vector.load %arg3[%76, %c0_34] : memref<512x128xf32, #tpu.memory_space<vmem>>, vector<1x128xf32>
    %78 = arith.index_cast %70 : i32 to index
    %c0_35 = arith.constant 0 : index
    %79 = vector.load %arg7[%78, %c0_35] : memref<8x128xf32, #tpu.memory_space<vmem>>, vector<1x128xf32>
    tpu.vector_store %arg7[%78, %c0_35], %77 {strides = array<i32>} : memref<8x128xf32, #tpu.memory_space<vmem>>, vector<1x128xf32>,
    %c8_i32_36 = arith.constant 8 : i32
    %80 = arith.muli %2, %c8_i32_36 : i32
    %c7_i32 = arith.constant 7 : i32
    %81 = arith.addi %80, %c7_i32 : i32
    %82 = arith.addi %0, %81 : i32
    %83 = arith.index_cast %82 : i32 to index
    %84 = memref.load %arg1[%83] : memref<16xi32, #tpu.memory_space<smem>>
    %c0_i32_37 = arith.constant 0 : i32
    %c511_i32_38 = arith.constant 511 : i32
    %85 = arith.maxsi %c0_i32_37, %84 : i32
    %86 = arith.minsi %c511_i32_38, %85 : i32
    %87 = arith.index_cast %86 : i32 to index
    %c0_39 = arith.constant 0 : index
    %88 = vector.load %arg3[%87, %c0_39] : memref<512x128xf32, #tpu.memory_space<vmem>>, vector<1x128xf32>
    %89 = arith.index_cast %81 : i32 to index
    %c0_40 = arith.constant 0 : index
    %90 = vector.load %arg7[%89, %c0_40] : memref<8x128xf32, #tpu.memory_space<vmem>>, vector<1x128xf32>
    tpu.vector_store %arg7[%89, %c0_40], %88 {strides = array<i32>} : memref<8x128xf32, #tpu.memory_space<vmem>>, vector<1x128xf32>,
    %c1_i32_41 = arith.constant 1 : i32
    %c0_42 = arith.constant 0 : index
    %c0_43 = arith.constant 0 : index
    %91 = vector.load %arg7[%c0_42, %c0_43] : memref<8x128xf32, #tpu.memory_space<vmem>>, vector<8x128xf32>
    %c0_44 = arith.constant 0 : index
    %c0_45 = arith.constant 0 : index
    %92 = vector.load %arg2[%c0_44, %c0_45] : memref<8x128xf32, #tpu.memory_space<vmem>>, vector<8x128xf32>
    %93 = arith.addf %91, %92 : vector<8x128xf32>
    %c0_46 = arith.constant 0 : index
    %c0_47 = arith.constant 0 : index
    %94 = vector.load %arg4[%c0_46, %c0_47] : memref<1x128xf32, #tpu.memory_space<vmem>>, vector<1x128xf32>
    %c0_48 = arith.constant 0 : index
    %c0_49 = arith.constant 0 : index
    %95 = vector.load %arg5[%c0_48, %c0_49] : memref<1x128xf32, #tpu.memory_space<vmem>>, vector<1x128xf32>
    %cst = arith.constant dense<0.000000e+00> : vector<8xf32>
    %96 = vector.multi_reduction <add>, %93, %cst [1] : vector<8x128xf32> to vector<8xf32>
    %97 = vector.shape_cast %96 : vector<8xf32> to vector<8x1xf32>
    %cst_50 = arith.constant 1.280000e+02 : f32
    %98 = vector.broadcast %cst_50 : f32 to vector<8x1xf32>
    %99 = arith.divf %97, %98 : vector<8x1xf32>
    %100 = vector.broadcast %99 : vector<8x1xf32> to vector<8x128xf32>
    %101 = arith.subf %93, %100 : vector<8x128xf32>
    %102 = arith.mulf %101, %101 : vector<8x128xf32>
    %cst_51 = arith.constant dense<0.000000e+00> : vector<8xf32>
    %103 = vector.multi_reduction <add>, %102, %cst_51 [1] : vector<8x128xf32> to vector<8xf32>
    %104 = vector.shape_cast %103 : vector<8xf32> to vector<8x1xf32>
    %cst_52 = arith.constant 1.280000e+02 : f32
    %105 = vector.broadcast %cst_52 : f32 to vector<8x1xf32>
    %106 = arith.divf %104, %105 : vector<8x1xf32>
    %cst_53 = arith.constant 9.99999996E-13 : f32
    %107 = vector.broadcast %cst_53 : f32 to vector<8x1xf32>
    %108 = arith.addf %106, %107 : vector<8x1xf32>
    %109 = math.rsqrt %108 : vector<8x1xf32>
    %110 = vector.broadcast %109 : vector<8x1xf32> to vector<8x128xf32>
    %111 = arith.mulf %101, %110 : vector<8x128xf32>
    %112 = vector.broadcast %94 : vector<1x128xf32> to vector<8x128xf32>
    %113 = arith.mulf %111, %112 : vector<8x128xf32>
    %114 = vector.broadcast %95 : vector<1x128xf32> to vector<8x128xf32>
    %115 = arith.addf %113, %114 : vector<8x128xf32>
    %c0_54 = arith.constant 0 : index
    %c0_55 = arith.constant 0 : index
    %116 = vector.load %arg6[%c0_54, %c0_55] : memref<8x128xf32, #tpu.memory_space<vmem>>, vector<8x128xf32>
    tpu.vector_store %arg6[%c0_54, %c0_55], %115 {strides = array<i32>} : memref<8x128xf32, #tpu.memory_space<vmem>>, vector<8x128xf32>,
    return
  }
  func.func @transform_0(%arg0: i32, %arg1: memref<16xi32, #tpu.memory_space<smem>>) -> (i32, i32) {
    %c1_i32 = arith.constant 1 : i32
    %c0_i32 = arith.constant 0 : i32
    %0 = arith.cmpi eq, %c1_i32, %c0_i32 : i32
    %c1_i32_0 = arith.constant 1 : i32
    %1 = arith.select %0, %c1_i32_0, %c1_i32 : i32
    %2 = arith.remsi %arg0, %1 : i32
    %c0_i32_1 = arith.constant 0 : i32
    %3 = arith.cmpi ne, %2, %c0_i32_1 : i32
    %c0_i32_2 = arith.constant 0 : i32
    %4 = arith.cmpi slt, %2, %c0_i32_2 : i32
    %c0_i32_3 = arith.constant 0 : i32
    %5 = arith.cmpi slt, %1, %c0_i32_3 : i32
    %6 = arith.xori %4, %5 : i1
    %7 = arith.andi %6, %3 : i1
    %8 = arith.addi %2, %1 : i32
    %9 = arith.select %7, %8, %2 : i32
    %c0_i32_4 = arith.constant 0 : i32
    %c0_i32_5 = arith.constant 0 : i32
    return %9, %c0_i32_4 : i32, i32
  }
  func.func @transform_1(%arg0: i32, %arg1: memref<16xi32, #tpu.memory_space<smem>>) -> (i32, i32) {
    %c0_i32 = arith.constant 0 : i32
    %c0_i32_0 = arith.constant 0 : i32
    %c0_i32_1 = arith.constant 0 : i32
    return %c0_i32, %c0_i32_0 : i32, i32
  }
  func.func @transform_2(%arg0: i32, %arg1: memref<16xi32, #tpu.memory_space<smem>>) -> (i32, i32) {
    %c0_i32 = arith.constant 0 : i32
    %c0_i32_0 = arith.constant 0 : i32
    %c0_i32_1 = arith.constant 0 : i32
    return %c0_i32, %c0_i32_0 : i32, i32
  }
  func.func @transform_3(%arg0: i32, %arg1: memref<16xi32, #tpu.memory_space<smem>>) -> (i32, i32) {
    %c0_i32 = arith.constant 0 : i32
    %c0_i32_0 = arith.constant 0 : i32
    %c0_i32_1 = arith.constant 0 : i32
    return %c0_i32, %c0_i32_0 : i32, i32
  }
  func.func @transform_4(%arg0: i32, %arg1: memref<16xi32, #tpu.memory_space<smem>>) -> (i32, i32) {
    %c0_i32 = arith.constant 0 : i32
    %c0_i32_0 = arith.constant 0 : i32
    return %arg0, %c0_i32 : i32, i32
  }
}

</mosaic_0001>

<bundles_post_ra>
// kernel: tpu_custom_call.1
= control target key start
LH: loop header
LB: loop body
LE: loop exit
PB: predicated region body
PF: predicated region fallthrough
CT: control target
= control target key end

     0   :  { %s932_s0 = inlined_call_operand.hbm [shape: s32[16], index: 0, kind: input, shape index: {}]   ;;  %s933_s1 = inlined_call_operand.hbm [shape: f32[32,128], index: 1, kind: input, shape index: {}]   ;;  %s934_s2 = inlined_call_operand.hbm [shape: f32[512,128], index: 2, kind: input, shape index: {}]   ;;  %s935_s3 = inlined_call_operand.vmem [shape: f32[1,128], index: 3, kind: input, shape index: {}]   ;;  %s936_s4 = inlined_call_operand.vmem [shape: f32[1,128], index: 4, kind: input, shape index: {}]   ;;  %s937_s5 = inlined_call_operand.hbm [shape: f32[16,128], index: 5, kind: output, shape index: {}]  }
   0x1   :  { %s540_s20 = scalar_lea.hbm %s932_s0, 16 }
   0x2   :  { %p541_p0 = scmp.ne.s32.totalorder %s932_s0, %s540_s20  ;;  %p544_p1 = scmp.lt.u32.totalorder %s540_s20, %s932_s0 }
   0x4   :  { %p546_p2 = pnand %p544_p1, %p541_p0 }
   0x6   :  { %549 = shalt.err (!%p546_p2)  }
   0x7   :  { %s680_s25 = smov [#allocation4]  }
   0x8   :  { %11 = dma.hbm_to_smem %s932_s0, 16, %s680_s25, [#allocation3] }
   0x9   :  { %650 = dma.done.wait [#allocation3], 16 }
   0xa   :  { %651 = vsyncadd [#allocation3], 4294967280 }
   0xb   :  { %13 = sfence }
   0xc   :  { %14 = vsyncpa [#allocation6], 0 }
   0xd   :  { %15 = vsyncpa [#allocation9], 0 }
   0xe   :  { %16 = vsyncpa [#allocation7], 0 }
   0xf   :  { %18 = vsyncpa [#allocation7 + $0x1], 0  ;;  %s728_s28 = smov 0   ;;  %s730_s29 = smov 0  }
  0x10   :  { %s732_s30 = smov 0   ;;  %s734_s6 = smov 0  }
  0x11 LB: > { %s749_s0 = sadd.s32 4294967295, %s678_s6   ;;  %s404_s7 = sadd.s32 4294967294, %s678_s6   ;;  %s678_s6 = sphi %s734_s6, %s955_s6   ;;  %s674_s30 = sphi %s732_s30, %s954_s30   ;;  %s670_s29 = sphi %s730_s29, %s953_s29   ;;  %s666_s28 = sphi %s728_s28, %s952_s28  }
  0x12   : > { %s753_s8 = sadd.s32 1, %s678_s6   ;;  %s115_s9 = sadd.s32 1, %s674_s30 }
  0x13   : > { %s112_s10 = ssub.s32 %s678_s6, %s753_s8  ;;  %p125_p3 = scmp.ne.s32.totalorder %s674_s30, %s670_s29 }
  0x14   : > { %p113_p4 = scmp.eq.s32.totalorder %s112_s10, 0  ;;  %p126_p5 = scmp.eq.s32.totalorder %s749_s0, 1 }
  0x15   : > { %p131_p6 = scmp.ne.s32.totalorder %s670_s29, %s666_s28  ;;  %p132_p7 = scmp.eq.s32.totalorder %s404_s7, 1 }
  0x16   : > { %s764_s11 = scalar_select %p113_p4, %s674_s30, %s115_s9  }
  0x17   : > { %p766_p8 = por %p126_p5, %p125_p3  ;;  %p770_p9 = por %p132_p7, %p131_p6 }
  0x18   : > { %p405_p10 = scmp.ge.s32.totalorder %s678_s6, 1  ;;  %p139_p11 = scmp.lt.s32.totalorder %s678_s6, 3 }
  0x19   : > { %s941_s12 = scalar_select %p766_p8, 1, 0 }
  0x1a   : > { %s942_s13 = scalar_select %p770_p9, 1, 0 }
  0x1b   : > { %p938_p12 = scmp.eq.s32.totalorder %s749_s0, 0  ;;  %p777_p13 = pnand %p405_p10, %p139_p11 }
  0x1c   : > { %s681_s15 = smov [#allocation5]   ;;  %s682_s17 = smov [#allocation8]  }
  0x1d   : > { %s943_s14 = scalar_select %p777_p13, 1, 0 }
  0x1e   : > { %s152_s16 = sshll.u32 %s681_s15, 4  ;;  %p485_p0 = pneg %p777_p13  ;;  %s153_s16 = int_to_ptr.vmem [resolvable:$true] %s152_s16 }
  0x1f   : > { %s162_s18 = sshll.u32 %s682_s17, 4  ;;  %s550_s22 = scalar_lea.hbm %s933_s1, 128  ;;  %s789_s18 = int_to_ptr.vmem [resolvable:$true] %s162_s18 }
  0x20   : > { %p785_p1 = pnand %p938_p12, %p485_p0  ;;  %p551_p2 = scmp.ne.s32.totalorder %s933_s1, %s550_s22 }
  0x21   : > { %s555_s27 = scalar_lea.hbm %s933_s1, 512  ;;  %p557_p7 = scmp.lt.u32.totalorder %s550_s22, %s933_s1 }
  0x22   : > { %p552_p3 = pneg %p785_p1  ;;  %p556_p6 = scmp.lt.u32.totalorder %s555_s27, %s550_s22 }
  0x24   : > { %p553_p4 = pnand %p552_p3, %p551_p2  ;;  %p558_p10 = por %p557_p7, %p556_p6 }
  0x26   : > { %p554_p5 = pneg %p553_p4 }
  0x28   : > { %p559_p11 = pnand %p558_p10, %p554_p5 }
  0x2a   : > { %562 = shalt.err (!%p559_p11)
}
  0x2b   : > { %s563_s10 = scalar_lea.vmem %s153_s16, 128  ;;  %p571_p4 = scmp.lt.s32.totalorder %s153_s16, %s153_s16 }
  0x2c   : > { %p564_p0 = scmp.ne.s32.totalorder %s153_s16, %s563_s10  ;;  %p572_p9 = scmp.lt.s32.totalorder %s563_s10, %s563_s10 }
  0x2e   : > { %p566_p12 = pnand %p564_p0, %p552_p3  ;;  %p573_p8 = por %p572_p9, %p571_p4 }
  0x30   : > { %p567_p2 = pneg %p566_p12 }
  0x32   : > { %p574_p13 = pnand %p573_p8, %p567_p2 }
  0x34   : > { %577 = shalt.err (!%p574_p13)
}
  0x35   : > { %488 = dma.hbm_to_vmem [thread:$0]  (!%p785_p1), %s933_s1, 128, %s153_s16, [#allocation6]  }
  0x36   : > { %s578_s22 = scalar_lea.hbm %s934_s2, 8192 }
  0x37   : > { %p579_p12 = scmp.ne.s32.totalorder %s934_s2, %s578_s22  ;;  %p585_p13 = scmp.lt.u32.totalorder %s578_s22, %s934_s2 }
  0x39   : > { %p581_p9 = pnand %p579_p12, %p552_p3 }
  0x3b   : > { %p582_p8 = pneg %p581_p9 }
  0x3d   : > { %p587_p5 = pnand %p585_p13, %p582_p8 }
  0x3f   : > { %590 = shalt.err (!%p587_p5)
}
  0x40   : > { %s591_s16 = scalar_lea.vmem %s789_s18, 8192  ;;  %p599_p11 = scmp.lt.s32.totalorder %s789_s18, %s789_s18 }
  0x41   : > { %p592_p6 = scmp.ne.s32.totalorder %s789_s18, %s591_s16  ;;  %p600_p0 = scmp.lt.s32.totalorder %s591_s16, %s591_s16 }
  0x43   : > { %p594_p7 = pnand %p592_p6, %p552_p3  ;;  %p601_p2 = por %p600_p0, %p599_p11 }
  0x45   : > { %p595_p10 = pneg %p594_p7 }
  0x47   : > { %p602_p4 = pnand %p601_p2, %p595_p10 }
  0x49   : > { %605 = shalt.err (!%p602_p4)
}
  0x4a   : > { %s683_s27 = smov 128   ;;  %s684_s7 = smov 8  }
  0x4b   : > { %491 = dma.hbm_to_vmem [thread:$0]  (!%p785_p1), %s934_s2, 8192, %s789_s18, [#allocation9], %s683_s27, %s683_s27, %s684_s7  }
  0x4c   : > { %p945_p12 = scmp.ne.s32.totalorder %s943_s14, 0 }
  0x4d   : > { %p946_p3 = scmp.eq.s32.totalorder (!%p945_p12), %s749_s0, 0 }
  0x4e   : > { %184 = sbr.rel (%p945_p12) target bundleno = 459 (0x1cb), region = 36 }
  0x55   : > { %653 = dma.done.wait (%p946_p3), [#allocation6], 128   ;;  %p947_p9 = pmov %p946_p3 }
  0x56   : > { %p948_p8 = pmov %p946_p3 }
  0x57   : > { %655 = vsyncadd (%p947_p9), [#allocation6], 4294967168 }
  0x58   : > { %657 = dma.done.wait (%p948_p8), [#allocation9], 8192   ;;  %p949_p13 = pmov %p946_p3 }
  0x59   : > { %s852_s19 = sshll.u32 %s749_s0, 3  ;;  %v282_v8 = vld [vmem:[#allocation5] sm:$0xff]  ;;  %v453_v19 = vld [vmem:[%s935_s3] ss:$0 sm:$0xff] }
  0x5a   : > { %659 = vsyncadd (%p949_p13), [#allocation9], 4294959104  ;;  %s210_s14 = sld [smem:[#allocation4 + %s852_s19]]  ;;  %s218_s18 = sadd.s32 1, %s852_s19  ;;  %v454_v21 = vld [vmem:[%s936_s4] ss:$0 sm:$0xff] }
  0x5b   : > { %s219_s15 = sld [smem:[#allocation4 + %s218_s18]]  ;;  %s227_s17 = sadd.s32 2, %s852_s19 }
  0x5c   : > { %s228_s20 = sld [smem:[#allocation4 + %s227_s17]]  ;;  %s236_s21 = sadd.s32 3, %s852_s19 }
  0x5d   : > { %s858_s22 = sld [smem:[#allocation4 + %s236_s21]]  ;;  %s245_s23 = sadd.s32 4, %s852_s19 }
  0x5e   : > { %s861_s24 = sld [smem:[#allocation4 + %s245_s23]]  ;;  %s254_s25 = sadd.s32 5, %s852_s19 }
  0x5f   : > { %s864_s26 = sld [smem:[#allocation4 + %s254_s25]]  ;;  %s263_s16 = sadd.s32 6, %s852_s19 }
  0x60   : > { %p211_p1 = scmp.gt.s32.totalorder %s210_s14, 0  ;;  %p413_p5 = scmp.lt.s32.totalorder %s210_s14, 511 }
  0x61   : > { %p220_p6 = scmp.gt.s32.totalorder %s219_s15, 0  ;;  %p418_p7 = scmp.lt.s32.totalorder %s219_s15, 511 }
  0x62   : > { %s957_s14 = smov (!%p211_p1, %s210_s14), 0  ;;  %p229_p10 = scmp.gt.s32.totalorder %s228_s20, 0 }
  0x63   : > { %s959_s15 = smov (!%p220_p6, %s219_s15), 0  ;;  %s961_s14 = smov (!%p413_p5, %s957_s14), 511 }
  0x64   : > { %s963_s15 = smov (!%p418_p7, %s959_s15), 511  ;;  %s215_s27 = scalar_lea.vmem [#allocation8], %s961_s14 }
  0x65   : > { %v216_v0 = vld [vmem:[%s215_s27] sm:$0x1]  ;;  %p423_p11 = scmp.lt.s32.totalorder %s228_s20, 511  ;;  %s224_s7 = scalar_lea.vmem [#allocation8], %s963_s15 }
  0x66   : > { %217 = vst [vmem:[#allocation2] sm:$0x1] %v216_v0  ;;  %v225_v1 = vld [vmem:[%s224_s7] sm:$0x1]  ;;  %s965_s20 = smov (!%p229_p10, %s228_s20), 0  ;;  %p238_p0 = scmp.gt.s32.totalorder %s858_s22, 0 }
  0x67   : > { %226 = vst [vmem:[#allocation2 + $0x1] sm:$0x1] %v225_v1  ;;  %p428_p2 = scmp.lt.s32.totalorder %s858_s22, 511  ;;  %s967_s20 = smov (!%p423_p11, %s965_s20), 511 }
  0x68   : > { %s969_s22 = smov (!%p238_p0, %s858_s22), 0  ;;  %p247_p4 = scmp.gt.s32.totalorder %s861_s24, 0 }
  0x69   : > { %s233_s9 = scalar_lea.vmem [#allocation8], %s967_s20  ;;  %s971_s22 = smov (!%p428_p2, %s969_s22), 511 }
  0x6a   : > { %v234_v2 = vld [vmem:[%s233_s9] sm:$0x1]  ;;  %s248_s10 = scalar_select %p247_p4, %s861_s24, 0 }
  0x6b   : > { %235 = vst [vmem:[#allocation2 + $0x2] sm:$0x1] %v234_v2  ;;  %p433_p12 = scmp.lt.s32.totalorder %s861_s24, 511  ;;  %s242_s14 = scalar_lea.vmem [#allocation8], %s971_s22 }
  0x6c   : > { %v243_v3 = vld [vmem:[%s242_s14] sm:$0x1]  ;;  %p256_p3 = scmp.gt.s32.totalorder %s864_s26, 0  ;;  %p438_p9 = scmp.lt.s32.totalorder %s864_s26, 511 }
  0x6d   : > { %244 = vst [vmem:[#allocation2 + $0x3] sm:$0x1] %v243_v3  ;;  %s973_s10 = smov (!%p433_p12, %s248_s10), 511  ;;  %s264_s18 = sld [smem:[#allocation4 + %s263_s16]] }
  0x6e   : > { %s975_s26 = smov (!%p256_p3, %s864_s26), 0  ;;  %s251_s15 = scalar_lea.vmem [#allocation8], %s973_s10 }
  0x6f   : > { %v252_v4 = vld [vmem:[%s251_s15] sm:$0x1]  ;;  %s977_s26 = smov (!%p438_p9, %s975_s26), 511  ;;  %s272_s17 = sadd.s32 7, %s852_s19 }
  0x70   : > { %253 = vst [vmem:[#allocation2 + $0x4] sm:$0x1] %v252_v4  ;;  %s273_s20 = sld [smem:[#allocation4 + %s272_s17]]  ;;  %s260_s21 = scalar_lea.vmem [#allocation8], %s977_s26 }
  0x71   : > { %v261_v5 = vld [vmem:[%s260_s21] sm:$0x1]  ;;  %s206_s19 = sand.u32 1, %s670_s29   ;;  %s456_s7 = sshll.u32 %s749_s0, 7 }
  0x72   : > { %262 = vst [vmem:[#allocation2 + $0x5] sm:$0x1] %v261_v5  ;;  %s411_s24 = sshll.u32 %s206_s19, 3  ;;  %s890_s15 = scalar_lea.hbm %s937_s5, %s456_s7 }
  0x73   : > { %p265_p8 = scmp.gt.s32.totalorder %s264_s18, 0  ;;  %p443_p13 = scmp.lt.s32.totalorder %s264_s18, 511 }
  0x74   : > { %s208_s9 = scalar_lea.vmem [#allocation10], %s411_s24  ;;  %s314_s17 = scalar_lea.sflag [#allocation7], %s206_s19 }
  0x75   : > { %s979_s18 = smov (!%p265_p8, %s264_s18), 0  ;;  %s327_s10 = sshll.u32 %s208_s9, 4  ;;  %s892_s10 = int_to_ptr.vmem [resolvable:$true] %s327_s10 }
  0x76   : > { %p274_p1 = scmp.gt.s32.totalorder %s273_s20, 0  ;;  %p448_p5 = scmp.lt.s32.totalorder %s273_s20, 511 }
  0x77   : > { %s981_s18 = smov (!%p443_p13, %s979_s18), 511  ;;  %p950_p7 = scmp.ne.s32.totalorder %s941_s12, 0 }
  0x78   : > { %s983_s20 = smov (!%p274_p1, %s273_s20), 0  ;;  %s269_s22 = scalar_lea.vmem [#allocation8], %s981_s18 }
  0x79   : > { %v270_v6 = vld [vmem:[%s269_s22] sm:$0x1]  ;;  %s985_s20 = smov (!%p448_p5, %s983_s20), 511  ;;  %s685_s0 = smov [#allocation10]  }
  0x7a   : > { %271 = vst [vmem:[#allocation2 + $0x6] sm:$0x1] %v270_v6  ;;  %s278_s23 = scalar_lea.vmem [#allocation8], %s985_s20  ;;  %s606_s20 = scalar_lea.vmem %s892_s10, 128 }
  0x7b   : > { %v279_v7 = vld [vmem:[%s278_s23] sm:$0x1]  ;;  %p607_p6 = scmp.ne.s32.totalorder %s892_s10, %s606_s20  ;;  %s610_s21 = sshll.u32 %s685_s0, 4  ;;  %s611_s21 = int_to_ptr.vmem [resolvable:$false] %s610_s21 }
  0x7c   : > { %280 = vst [vmem:[#allocation2 + $0x7] sm:$0x1] %v279_v7  ;;  %s612_s22 = scalar_lea.vmem %s611_s21, 256  ;;  %p613_p0 = scmp.lt.s32.totalorder %s892_s10, %s611_s21 }
  0x7d   : > { %p608_p10 = pnand %p607_p6, %p950_p7  ;;  %p614_p2 = scmp.lt.s32.totalorder %s612_s22, %s606_s20 }
  0x7f   : > { %p609_p11 = pneg %p608_p10  ;;  %p615_p4 = por %p614_p2, %p613_p0 }
  0x81   : > { %p616_p12 = pnand %p615_p4, %p609_p11 }
  0x83   : > { %v281_v9 = vld [vmem:[#allocation2] sm:$0xff] }
  0x84   : > { %v283_v10 = vadd.f32 %v282_v8, %v281_v9 }
  0x86   : > { %286 = vadd.xlane.f32.xlu0 %v283_v10 }
 0x113   : > { %v287_v11 = vpop.xlane.xlu0 %286 }
 0x114   : > { %v289_v12 = vmul.f32 0.0078125, %v287_v11 }
 0x116   : > { %v290_v13 = vsub.f32 %v283_v10, %v289_v12 }
 0x118   : > { %v291_v14 = vmul.f32 %v290_v13, %v290_v13 }
 0x11a   : > { %292 = vadd.xlane.f32.xlu0 %v291_v14 }
 0x1a7   : > { %v293_v15 = vpop.xlane.xlu0 %292 }
 0x1a8   : > { %v294_v16 = vmul.f32 0.0078125, %v293_v15 }
 0x1aa   : > { %v295_v17 = vadd.f32 1e-12, %v294_v16 }
 0x1ac   : > { %538 = vrsqrt.f32 %v295_v17 }
 0x1b6   : > { %v539_v18 = vpop.eup %538 }
 0x1b7   : > { %v297_v20 = vmul.f32 %v539_v18, %v290_v13 }
 0x1b9   : > { %v304_v22 = vmul.f32 %v453_v19, %v297_v20 }
 0x1bb   : > { %v311_v23 = vadd.f32 %v454_v21, %v304_v22 }
 0x1bd   : > { %312 = vst [vmem:[%s208_s9] sm:$0xff] %v311_v23 }
 0x1be   : > { %619 = shalt.err (!%p616_p12)
}
 0x1bf   : > { %s620_s23 = scalar_lea.hbm %s890_s15, 128  ;;  %s624_s25 = scalar_lea.hbm %s937_s5, 256 }
 0x1c0   : > { %p621_p3 = scmp.ne.s32.totalorder %s890_s15, %s620_s23  ;;  %p625_p13 = scmp.lt.u32.totalorder %s890_s15, %s937_s5 }
 0x1c1   : > { %p626_p1 = scmp.lt.u32.totalorder %s624_s25, %s620_s23  ;;  %p628_p6 = scmp.lt.u32.totalorder %s620_s23, %s890_s15 }
 0x1c2   : > { %p622_p9 = pnand %p621_p3, %p950_p7 }
 0x1c3   : > { %p627_p5 = por %p626_p1, %p625_p13 }
 0x1c4   : > { %p623_p8 = pneg %p622_p9 }
 0x1c5   : > { %p629_p10 = por %p628_p6, %p627_p5 }
 0x1c7   : > { %p630_p11 = pnand %p629_p10, %p623_p8 }
 0x1c9   : > { %633 = shalt.err (!%p630_p11)
}
 0x1ca   : > { %483 = dma.vmem_to_hbm [thread:$0]  (%p950_p7), %s892_s10, 128, %s890_s15, %s314_s17  }
 0x1cb PF: > { %p500_p0 = scmp.ge.s32.totalorder %s678_s6, 2  ;;  %s339_s27 = sand.u32 1, %s666_s28  }
 0x1cc   : > { %p951_p2 = scmp.ne.s32.totalorder %s942_s13, 0  ;;  %s340_s7 = scalar_lea.sflag [#allocation7], %s339_s27 }
 0x1ce   : > { %p493_p4 = pnand %p500_p0, %p951_p2 }
 0x1d0   : > { %661 = dma.done.wait (!%p493_p4), %s340_s7, 128  }
 0x1d1   : > { %663 = vsyncadd (!%p493_p4), %s340_s7, 4294967168  ;;  %p21_p12 = scmp.ge.s32.totalorder %s753_s8, 4   ;;  %s952_s28 = smov %s670_s29 }
 0x1d2   : > { %s953_s29 = smov %s674_s30  ;;  %s954_s30 = smov %s764_s11 }
 0x1d3   : > { %s955_s6 = smov %s753_s8  ;;  %23 = sbr.rel (!%p21_p12) target bundleno = 17 (0x11), region = 85 }
 0x1da   :  { %345 = vsyncpa [#allocation6], 1 }
 0x1db   :  { %347 = vsyncpa [#allocation6 + $0x1], 1 }
 0x1dc   :  { %348 = vsyncpa [#allocation9], 1 }
 0x1dd   :  { %349 = vsyncpa [#allocation7], 1 }
 0x1de   :  { %351 = vsyncpa [#allocation7 + $0x1], 1 }

</bundles_post_ra>
